<compile_context>
chip_gen: v7x
topology: tpu7x:2x2x1
jax: 0.10.0
libtpu: 0.0.40
codegen_flags: <defaults>
</compile_context>

<pallas_src>
import functools

import jax
import jax.numpy as jnp
from jax.experimental import pallas as pl
from jax.experimental.pallas import tpu as pltpu

F32_NEG_MAX = -3.4028235e38  # matches torch masked_fill_(-torch.finfo(f32).max)

# TODO(synk): FPS subsampling (ds_frac < 1) and the stochastic top-k Monte-Carlo neighborhood
# (mc_samples < N, training-time ball-radius EMA) are not implemented; with ds_frac=1 and
# mc_samples >= N in eval mode the neighborhood is the full masked ball, which is what the
# kernel computes.
# TODO(synk): for very large N the (TQ, N) key extent should be streamed flash-style (online
# softmax over key blocks); for production dim < 128 the output could be padded/blocked to a
# lane-dense (multiple of 128) last dim to avoid masked partial stores.


def _lie_attn_kernel(vals_full_ref, vals_q_ref, bias_ref,
                     wq_ref, bq_ref, wkv_ref, bkv_ref, wo_ref, bo_ref,
                     out_ref, o_scr, *, heads, dim_head):
    inner = heads * dim_head

    x_all = vals_full_ref[0]   # (N, C)  original values of every token in this batch row
    x_q = vals_q_ref[0]        # (TQ, C) original values of this query tile (queries + residual)
    bias = bias_ref[0]         # (TQ, N) loc-attn MLP bias + neighborhood mask (NEG_MAX outside)

    # ---- Pass(nn.LayerNorm(dim)): normalization only; affine folded into wq/bq/wkv/bkv ----
    def _normalize(x):
        mu = jnp.mean(x, axis=-1, keepdims=True)
        var = jnp.mean((x - mu) ** 2, axis=-1, keepdims=True)
        return (x - mu) * jax.lax.rsqrt(var + 1e-5)

    xq_hat = _normalize(x_q).astype(jnp.bfloat16)
    xk_hat = _normalize(x_all).astype(jnp.bfloat16)

    # ---- projections: q for the query tile (scale pre-folded), fused K|V for all tokens ----
    q = jnp.dot(xq_hat, wq_ref[...], preferred_element_type=jnp.float32) + bq_ref[...]
    kv = jnp.dot(xk_hat, wkv_ref[...], preferred_element_type=jnp.float32) + bkv_ref[...]
    q_b = q.astype(jnp.bfloat16)
    k_b = kv[:, :inner].astype(jnp.bfloat16)
    v_b = kv[:, inner:].astype(jnp.bfloat16)

    # ---- multi-head attention with additive location/mask bias ----
    for h in range(heads):
        sl = slice(h * dim_head, (h + 1) * dim_head)
        sim = jax.lax.dot_general(
            q_b[:, sl], k_b[:, sl], (((1,), (1,)), ((), ())),
            preferred_element_type=jnp.float32) + bias            # (TQ, N)
        sim = sim - jnp.max(sim, axis=-1, keepdims=True)
        e = jnp.exp(sim)
        p = e * pl.reciprocal(jnp.sum(e, axis=-1, keepdims=True), approx=True)
        o_scr[:, sl] = jnp.dot(p.astype(jnp.bfloat16), v_b[:, sl],
                               preferred_element_type=jnp.float32)

    combined = jnp.dot(o_scr[...].astype(jnp.bfloat16), wo_ref[...],
                       preferred_element_type=jnp.float32) + bo_ref[...]

    # ---- wrapper residual: new_values[..., :dim] += sub_values ----
    out_ref[0] = combined + x_q


def init_params(key, dim, heads, dim_head, lie_dim):
    inner = heads * dim_head
    hid = 4 * lie_dim
    ks = jax.random.split(key, 8)
    return {
        # nn.LayerNorm(dim): default weight=1, bias=0
        'ln_g': jnp.ones((1, dim), jnp.float32),
        'ln_b': jnp.zeros((1, dim), jnp.float32),
        # nn.Linear(dim, inner, bias=False) x3  (stored transposed: x @ W)
        'wq': jax.random.normal(ks[0], (dim, inner), jnp.float32) * 0.1,
        'wk': jax.random.normal(ks[1], (dim, inner), jnp.float32) * 0.1,
        'wv': jax.random.normal(ks[2], (dim, inner), jnp.float32) * 0.1,
        # nn.Linear(inner, dim)
        'wo': jax.random.normal(ks[3], (inner, dim), jnp.float32) * 0.1,
        'bo': jax.random.normal(ks[4], (1, dim), jnp.float32) * 0.01,
        # loc_attn_mlp: Linear(lie_dim, 4*lie_dim) -> ReLU -> Linear(4*lie_dim, 1)
        'w1': jax.random.normal(ks[5], (lie_dim, hid), jnp.float32) * 0.2,
        'b1': jax.random.normal(ks[6], (1, hid), jnp.float32) * 0.01,
        'w2': jax.random.normal(ks[7], (hid, 1), jnp.float32) * 0.2,
        'b2': jnp.zeros((1, 1), jnp.float32),
    }


def lie_self_attention_wrapper(inp, params, *, heads, dim_head, radius=2.0):
    coords, vals, mask, edges = inp        # coords: (B, N, N, D) Lie-algebra pair embeddings
    B, N, C = vals.shape
    inner = heads * dim_head
    vals_f32 = vals.astype(jnp.float32)

    # ---- location-attention MLP + ball-neighborhood mask -> one additive bias (B, N, N) ----
    # O(N^2 * lie_dim) and independent of q/k/v; computed here (plain XLA) instead of as an
    # O(N^3) block-diagonal matmul inside the kernel.
    cf = coords.astype(jnp.float32)
    h1 = jax.nn.relu(jnp.einsum('bijd,dh->bijh', cf, params['w1']) + params['b1'][0])
    loc = jnp.einsum('bijh,h->bij', h1, params['w2'][:, 0]) + params['b2'][0, 0]
    dist2 = jnp.sum(cf * cf, axis=-1)
    valid = (dist2 < radius * radius) & mask[:, None, :] & mask[:, :, None]
    bias = jnp.where(valid, loc, F32_NEG_MAX).astype(jnp.float32)            # (B, N, N)

    # ---- fold LayerNorm affine + attention scale into projection weights (bf16 MXU operands) ----
    g, beta = params['ln_g'][0], params['ln_b'][0]
    scale = dim_head ** -0.5
    wq = ((g[:, None] * params['wq']) * scale).astype(jnp.bfloat16)          # (C, inner)
    bq = ((beta @ params['wq']) * scale)[None, :].astype(jnp.float32)        # (1, inner)
    wkv_f32 = jnp.concatenate([params['wk'], params['wv']], axis=1)          # (C, 2*inner)
    wkv = (g[:, None] * wkv_f32).astype(jnp.bfloat16)
    bkv = (beta @ wkv_f32)[None, :].astype(jnp.float32)                      # (1, 2*inner)
    wo = params['wo'].astype(jnp.bfloat16)                                   # (inner, C)
    bo = params['bo'].astype(jnp.float32)                                    # (1, C)

    # ---- query tiling ----
    TQ = 128 if N % 128 == 0 else N
    grid = (B, N // TQ)

    kernel = functools.partial(_lie_attn_kernel, heads=heads, dim_head=dim_head)
    const2d = lambda shape: pl.BlockSpec(shape, lambda b, qi: (0, 0))

    new_vals = pl.pallas_call(
        kernel,
        out_shape=jax.ShapeDtypeStruct((B, N, C), jnp.float32),
        grid=grid,
        in_specs=[
            pl.BlockSpec((1, N, C), lambda b, qi: (b, 0, 0)),     # full row for K/V (1 DMA/batch)
            pl.BlockSpec((1, TQ, C), lambda b, qi: (b, qi, 0)),   # query tile (Q + residual)
            pl.BlockSpec((1, TQ, N), lambda b, qi: (b, qi, 0)),   # loc + neighborhood-mask bias
            const2d((C, inner)), const2d((1, inner)),             # wq (scale+LN folded), bq
            const2d((C, 2 * inner)), const2d((1, 2 * inner)),     # fused wkv, bkv
            const2d((inner, C)), const2d((1, C)),                 # wo, bo
        ],
        out_specs=pl.BlockSpec((1, TQ, C), lambda b, qi: (b, qi, 0)),
        scratch_shapes=[pltpu.VMEM((TQ, inner), jnp.float32)],
        compiler_params=pltpu.CompilerParams(
            dimension_semantics=("parallel", "parallel"),
            vmem_limit_bytes=32 * 1024 * 1024),
    )(vals_f32, vals_f32, bias, wq, bq, wkv, bkv, wo, bo)

    # new_coords = sub_coords (identity subsample); mask / edges pass through unchanged
    return coords, new_vals, mask, edges


def reference(inp, params, *, heads, dim_head, radius=2.0):
    """Pure-JAX f32 reference mirroring the PyTorch forward (for correctness check)."""
    coords, vals, mask, edges = inp
    B, N, C = vals.shape
    x = vals.astype(jnp.float32)
    mu = x.mean(-1, keepdims=True)
    var = ((x - mu) ** 2).mean(-1, keepdims=True)
    x_ln = (x - mu) / jnp.sqrt(var + 1e-5) * params['ln_g'][0] + params['ln_b'][0]
    q, k, v = x_ln @ params['wq'], x_ln @ params['wk'], x_ln @ params['wv']
    split = lambda t: t.reshape(B, N, heads, dim_head).transpose(0, 2, 1, 3)
    q, k, v = split(q), split(k), split(v)
    sim = jnp.einsum('bhid,bhjd->bhij', q, k) * dim_head ** -0.5
    h1 = jax.nn.relu(jnp.einsum('bijd,dh->bijh', coords, params['w1']) + params['b1'][0])
    loc = jnp.einsum('bijh,ho->bijo', h1, params['w2'])[..., 0] + params['b2'][0, 0]
    sim = sim + loc[:, None]
    dist = jnp.linalg.norm(coords, axis=-1)
    valid = (dist < radius) & mask[:, None, :] & mask[:, :, None]
    sim = jnp.where(valid[:, None], sim, F32_NEG_MAX)
    attn = jax.nn.softmax(sim, axis=-1)
    o = jnp.einsum('bhij,bhjd->bhid', attn, v).transpose(0, 2, 1, 3).reshape(B, N, heads * dim_head)
    combined = o @ params['wo'] + params['bo'][0]
    return coords, combined + x, mask, edges


if __name__ == "__main__":
    B, N, DIM, HEADS, DIM_HEAD, LIE_DIM = 2, 8, 32, 2, 16, 6  # SE(3): lie_dim = 6
    key = jax.random.PRNGKey(0)
    k_coords, k_vals, k_params = jax.random.split(key, 3)

    coords = jax.random.normal(k_coords, (B, N, N, LIE_DIM), jnp.float32)
    vals = jax.random.normal(k_vals, (B, N, DIM), jnp.float32)
    mask = jnp.ones((B, N), dtype=bool).at[1, -1].set(False)
    edges = None
    params = init_params(k_params, DIM, HEADS, DIM_HEAD, LIE_DIM)

    out = lie_self_attention_wrapper((coords, vals, mask, edges), params,
                                     heads=HEADS, dim_head=DIM_HEAD, radius=2.0)
    jax.block_until_ready(out[1])

    ref = reference((coords, vals, mask, edges), params,
                    heads=HEADS, dim_head=DIM_HEAD, radius=2.0)
    # bf16 MXU operands with f32 accumulation => compare at bf16-level tolerance
    assert jnp.allclose(out[1], ref[1], atol=5e-2, rtol=5e-2), "Pallas kernel mismatch vs JAX reference"

    print("KERNEL_OK")
</pallas_src>

<mosaic_0001>
module attributes {stable_mosaic.version = 11 : i64} {
  func.func @_lie_attn_kernel(%arg0: i32, %arg1: i32, %arg2: memref<1x8x32xf32, #tpu.memory_space<vmem>>, %arg3: memref<1x8x32xf32, #tpu.memory_space<vmem>>, %arg4: memref<1x8x8xf32, #tpu.memory_space<vmem>>, %arg5: memref<32x32xbf16, #tpu.memory_space<vmem>>, %arg6: memref<1x32xf32, #tpu.memory_space<vmem>>, %arg7: memref<32x64xbf16, #tpu.memory_space<vmem>>, %arg8: memref<1x64xf32, #tpu.memory_space<vmem>>, %arg9: memref<32x32xbf16, #tpu.memory_space<vmem>>, %arg10: memref<1x32xf32, #tpu.memory_space<vmem>>, %arg11: memref<1x8x32xf32, #tpu.memory_space<vmem>>, %arg12: memref<8x32xf32, #tpu.memory_space<vmem>>) attributes {dimension_semantics = [#tpu.dimension_semantics<parallel>, #tpu.dimension_semantics<parallel>], iteration_bounds = array<i64: 2, 1>, scalar_prefetch = 0 : i64, scratch_operands = 1 : i64, tpu.core_type = #tpu.core_type<tc>, window_params = [{transform_indices = @transform_0, window_bounds = array<i64: 1, 8, 32>}, {transform_indices = @transform_1, window_bounds = array<i64: 1, 8, 32>}, {transform_indices = @transform_2, window_bounds = array<i64: 1, 8, 8>}, {pipeline_mode = #tpu.pipeline_mode<synchronous>, transform_indices = @transform_3, window_bounds = array<i64: 32, 32>}, {pipeline_mode = #tpu.pipeline_mode<synchronous>, transform_indices = @transform_4, window_bounds = array<i64: 1, 32>}, {pipeline_mode = #tpu.pipeline_mode<synchronous>, transform_indices = @transform_5, window_bounds = array<i64: 32, 64>}, {pipeline_mode = #tpu.pipeline_mode<synchronous>, transform_indices = @transform_6, window_bounds = array<i64: 1, 64>}, {pipeline_mode = #tpu.pipeline_mode<synchronous>, transform_indices = @transform_7, window_bounds = array<i64: 32, 32>}, {pipeline_mode = #tpu.pipeline_mode<synchronous>, transform_indices = @transform_8, window_bounds = array<i64: 1, 32>}, {transform_indices = @transform_9, window_bounds = array<i64: 1, 8, 32>}]} {
    %c0 = arith.constant 0 : index
    %c0_0 = arith.constant 0 : index
    %c0_1 = arith.constant 0 : index
    %0 = vector.load %arg2[%c0, %c0_0, %c0_1] : memref<1x8x32xf32, #tpu.memory_space<vmem>>, vector<1x8x32xf32>
    %1 = vector.shape_cast %0 : vector<1x8x32xf32> to vector<8x32xf32>
    %c0_2 = arith.constant 0 : index
    %c0_3 = arith.constant 0 : index
    %c0_4 = arith.constant 0 : index
    %2 = vector.load %arg3[%c0_2, %c0_3, %c0_4] : memref<1x8x32xf32, #tpu.memory_space<vmem>>, vector<1x8x32xf32>
    %3 = vector.shape_cast %2 : vector<1x8x32xf32> to vector<8x32xf32>
    %c0_5 = arith.constant 0 : index
    %c0_6 = arith.constant 0 : index
    %c0_7 = arith.constant 0 : index
    %4 = vector.load %arg4[%c0_5, %c0_6, %c0_7] : memref<1x8x8xf32, #tpu.memory_space<vmem>>, vector<1x8x8xf32>
    %5 = vector.shape_cast %4 : vector<1x8x8xf32> to vector<8x8xf32>
    %cst = arith.constant dense<0.000000e+00> : vector<8xf32>
    %6 = vector.multi_reduction <add>, %3, %cst [1] : vector<8x32xf32> to vector<8xf32>
    %7 = vector.shape_cast %6 : vector<8xf32> to vector<8x1xf32>
    %cst_8 = arith.constant 3.200000e+01 : f32
    %8 = vector.broadcast %cst_8 : f32 to vector<8x1xf32>
    %9 = arith.divf %7, %8 : vector<8x1xf32>
    %10 = vector.broadcast %9 : vector<8x1xf32> to vector<8x32xf32>
    %11 = arith.subf %3, %10 : vector<8x32xf32>
    %12 = arith.mulf %11, %11 : vector<8x32xf32>
    %cst_9 = arith.constant dense<0.000000e+00> : vector<8xf32>
    %13 = vector.multi_reduction <add>, %12, %cst_9 [1] : vector<8x32xf32> to vector<8xf32>
    %14 = vector.shape_cast %13 : vector<8xf32> to vector<8x1xf32>
    %cst_10 = arith.constant 3.200000e+01 : f32
    %15 = vector.broadcast %cst_10 : f32 to vector<8x1xf32>
    %16 = arith.divf %14, %15 : vector<8x1xf32>
    %17 = vector.broadcast %9 : vector<8x1xf32> to vector<8x32xf32>
    %18 = arith.subf %3, %17 : vector<8x32xf32>
    %cst_11 = arith.constant 9.99999974E-6 : f32
    %19 = vector.broadcast %cst_11 : f32 to vector<8x1xf32>
    %20 = arith.addf %16, %19 : vector<8x1xf32>
    %21 = math.rsqrt %20 : vector<8x1xf32>
    %22 = vector.broadcast %21 : vector<8x1xf32> to vector<8x32xf32>
    %23 = arith.mulf %18, %22 : vector<8x32xf32>
    %24 = arith.truncf %23 : vector<8x32xf32> to vector<8x32xbf16>
    %cst_12 = arith.constant dense<0.000000e+00> : vector<8xf32>
    %25 = vector.multi_reduction <add>, %1, %cst_12 [1] : vector<8x32xf32> to vector<8xf32>
    %26 = vector.shape_cast %25 : vector<8xf32> to vector<8x1xf32>
    %cst_13 = arith.constant 3.200000e+01 : f32
    %27 = vector.broadcast %cst_13 : f32 to vector<8x1xf32>
    %28 = arith.divf %26, %27 : vector<8x1xf32>
    %29 = vector.broadcast %28 : vector<8x1xf32> to vector<8x32xf32>
    %30 = arith.subf %1, %29 : vector<8x32xf32>
    %31 = arith.mulf %30, %30 : vector<8x32xf32>
    %cst_14 = arith.constant dense<0.000000e+00> : vector<8xf32>
    %32 = vector.multi_reduction <add>, %31, %cst_14 [1] : vector<8x32xf32> to vector<8xf32>
    %33 = vector.shape_cast %32 : vector<8xf32> to vector<8x1xf32>
    %cst_15 = arith.constant 3.200000e+01 : f32
    %34 = vector.broadcast %cst_15 : f32 to vector<8x1xf32>
    %35 = arith.divf %33, %34 : vector<8x1xf32>
    %36 = vector.broadcast %28 : vector<8x1xf32> to vector<8x32xf32>
    %37 = arith.subf %1, %36 : vector<8x32xf32>
    %cst_16 = arith.constant 9.99999974E-6 : f32
    %38 = vector.broadcast %cst_16 : f32 to vector<8x1xf32>
    %39 = arith.addf %35, %38 : vector<8x1xf32>
    %40 = math.rsqrt %39 : vector<8x1xf32>
    %41 = vector.broadcast %40 : vector<8x1xf32> to vector<8x32xf32>
    %42 = arith.mulf %37, %41 : vector<8x32xf32>
    %43 = arith.truncf %42 : vector<8x32xf32> to vector<8x32xbf16>
    %c0_17 = arith.constant 0 : index
    %c0_18 = arith.constant 0 : index
    %44 = vector.load %arg5[%c0_17, %c0_18] : memref<32x32xbf16, #tpu.memory_space<vmem>>, vector<32x32xbf16>
    %cst_19 = arith.constant dense<0.000000e+00> : vector<8x32xf32>
    %45 = tpu.matmul %24, %44, %cst_19 {dimension_numbers = #tpu.dot_dimension_numbers<[1], [0], [0], [1], [0, 0, 1, 1], [], []>} : vector<8x32xbf16>, vector<32x32xbf16>, vector<8x32xf32> -> vector<8x32xf32>
    %c0_20 = arith.constant 0 : index
    %c0_21 = arith.constant 0 : index
    %46 = vector.load %arg6[%c0_20, %c0_21] : memref<1x32xf32, #tpu.memory_space<vmem>>, vector<1x32xf32>
    %47 = vector.broadcast %46 : vector<1x32xf32> to vector<8x32xf32>
    %48 = arith.addf %45, %47 : vector<8x32xf32>
    %c0_22 = arith.constant 0 : index
    %c0_23 = arith.constant 0 : index
    %49 = vector.load %arg7[%c0_22, %c0_23] : memref<32x64xbf16, #tpu.memory_space<vmem>>, vector<32x64xbf16>
    %cst_24 = arith.constant dense<0.000000e+00> : vector<8x64xf32>
    %50 = tpu.matmul %43, %49, %cst_24 {dimension_numbers = #tpu.dot_dimension_numbers<[1], [0], [0], [1], [0, 0, 1, 1], [], []>} : vector<8x32xbf16>, vector<32x64xbf16>, vector<8x64xf32> -> vector<8x64xf32>
    %c0_25 = arith.constant 0 : index
    %c0_26 = arith.constant 0 : index
    %51 = vector.load %arg8[%c0_25, %c0_26] : memref<1x64xf32, #tpu.memory_space<vmem>>, vector<1x64xf32>
    %52 = vector.broadcast %51 : vector<1x64xf32> to vector<8x64xf32>
    %53 = arith.addf %50, %52 : vector<8x64xf32>
    %54 = arith.truncf %48 : vector<8x32xf32> to vector<8x32xbf16>
    %55 = vector.extract_strided_slice %53 {offsets = [0, 0], sizes = [8, 32], strides = [1, 1]} : vector<8x64xf32> to vector<8x32xf32>
    %56 = arith.truncf %55 : vector<8x32xf32> to vector<8x32xbf16>
    %57 = vector.extract_strided_slice %53 {offsets = [0, 32], sizes = [8, 32], strides = [1, 1]} : vector<8x64xf32> to vector<8x32xf32>
    %58 = arith.truncf %57 : vector<8x32xf32> to vector<8x32xbf16>
    %59 = vector.extract_strided_slice %54 {offsets = [0, 0], sizes = [8, 16], strides = [1, 1]} : vector<8x32xbf16> to vector<8x16xbf16>
    %60 = vector.extract_strided_slice %56 {offsets = [0, 0], sizes = [8, 16], strides = [1, 1]} : vector<8x32xbf16> to vector<8x16xbf16>
    %cst_27 = arith.constant dense<0.000000e+00> : vector<8x8xf32>
    %61 = tpu.matmul %59, %60, %cst_27 {dimension_numbers = #tpu.dot_dimension_numbers<[1], [1], [0], [0], [0, 0, 1, 0], [], []>} : vector<8x16xbf16>, vector<8x16xbf16>, vector<8x8xf32> -> vector<8x8xf32>
    %62 = arith.addf %61, %5 : vector<8x8xf32>
    %cst_28 = arith.constant dense<0xFF800000> : vector<8xf32>
    %63 = vector.multi_reduction <maximumf>, %62, %cst_28 [1] : vector<8x8xf32> to vector<8xf32>
    %64 = vector.shape_cast %63 : vector<8xf32> to vector<8x1xf32>
    %65 = vector.broadcast %64 : vector<8x1xf32> to vector<8x8xf32>
    %66 = arith.subf %62, %65 : vector<8x8xf32>
    %67 = math.exp %66 : vector<8x8xf32>
    %cst_29 = arith.constant dense<0.000000e+00> : vector<8xf32>
    %68 = vector.multi_reduction <add>, %67, %cst_29 [1] : vector<8x8xf32> to vector<8xf32>
    %69 = vector.shape_cast %68 : vector<8xf32> to vector<8x1xf32>
    %70 = tpu.reciprocal %69 {approx = true} : vector<8x1xf32> -> vector<8x1xf32>
    %71 = vector.broadcast %70 : vector<8x1xf32> to vector<8x8xf32>
    %72 = arith.mulf %67, %71 : vector<8x8xf32>
    %73 = arith.truncf %72 : vector<8x8xf32> to vector<8x8xbf16>
    %74 = vector.extract_strided_slice %58 {offsets = [0, 0], sizes = [8, 16], strides = [1, 1]} : vector<8x32xbf16> to vector<8x16xbf16>
    %cst_30 = arith.constant dense<0.000000e+00> : vector<8x16xf32>
    %75 = tpu.matmul %73, %74, %cst_30 {dimension_numbers = #tpu.dot_dimension_numbers<[1], [0], [0], [1], [0, 0, 1, 1], [], []>} : vector<8x8xbf16>, vector<8x16xbf16>, vector<8x16xf32> -> vector<8x16xf32>
    %c0_31 = arith.constant 0 : index
    %c0_32 = arith.constant 0 : index
    %76 = vector.load %arg12[%c0_31, %c0_32] : memref<8x32xf32, #tpu.memory_space<vmem>>, vector<8x16xf32>
    tpu.vector_store %arg12[%c0_31, %c0_32], %75 {strides = array<i32>} : memref<8x32xf32, #tpu.memory_space<vmem>>, vector<8x16xf32>,
    %77 = vector.extract_strided_slice %54 {offsets = [0, 16], sizes = [8, 16], strides = [1, 1]} : vector<8x32xbf16> to vector<8x16xbf16>
    %78 = vector.extract_strided_slice %56 {offsets = [0, 16], sizes = [8, 16], strides = [1, 1]} : vector<8x32xbf16> to vector<8x16xbf16>
    %cst_33 = arith.constant dense<0.000000e+00> : vector<8x8xf32>
    %79 = tpu.matmul %77, %78, %cst_33 {dimension_numbers = #tpu.dot_dimension_numbers<[1], [1], [0], [0], [0, 0, 1, 0], [], []>} : vector<8x16xbf16>, vector<8x16xbf16>, vector<8x8xf32> -> vector<8x8xf32>
    %80 = arith.addf %79, %5 : vector<8x8xf32>
    %cst_34 = arith.constant dense<0xFF800000> : vector<8xf32>
    %81 = vector.multi_reduction <maximumf>, %80, %cst_34 [1] : vector<8x8xf32> to vector<8xf32>
    %82 = vector.shape_cast %81 : vector<8xf32> to vector<8x1xf32>
    %83 = vector.broadcast %82 : vector<8x1xf32> to vector<8x8xf32>
    %84 = arith.subf %80, %83 : vector<8x8xf32>
    %85 = math.exp %84 : vector<8x8xf32>
    %cst_35 = arith.constant dense<0.000000e+00> : vector<8xf32>
    %86 = vector.multi_reduction <add>, %85, %cst_35 [1] : vector<8x8xf32> to vector<8xf32>
    %87 = vector.shape_cast %86 : vector<8xf32> to vector<8x1xf32>
    %88 = tpu.reciprocal %87 {approx = true} : vector<8x1xf32> -> vector<8x1xf32>
    %89 = vector.broadcast %88 : vector<8x1xf32> to vector<8x8xf32>
    %90 = arith.mulf %85, %89 : vector<8x8xf32>
    %91 = arith.truncf %90 : vector<8x8xf32> to vector<8x8xbf16>
    %92 = vector.extract_strided_slice %58 {offsets = [0, 16], sizes = [8, 16], strides = [1, 1]} : vector<8x32xbf16> to vector<8x16xbf16>
    %cst_36 = arith.constant dense<0.000000e+00> : vector<8x16xf32>
    %93 = tpu.matmul %91, %92, %cst_36 {dimension_numbers = #tpu.dot_dimension_numbers<[1], [0], [0], [1], [0, 0, 1, 1], [], []>} : vector<8x8xbf16>, vector<8x16xbf16>, vector<8x16xf32> -> vector<8x16xf32>
    %c0_37 = arith.constant 0 : index
    %c16 = arith.constant 16 : index
    %94 = vector.load %arg12[%c0_37, %c16] : memref<8x32xf32, #tpu.memory_space<vmem>>, vector<8x16xf32>
    tpu.vector_store %arg12[%c0_37, %c16], %93 {strides = array<i32>} : memref<8x32xf32, #tpu.memory_space<vmem>>, vector<8x16xf32>,
    %c0_38 = arith.constant 0 : index
    %c0_39 = arith.constant 0 : index
    %95 = vector.load %arg12[%c0_38, %c0_39] : memref<8x32xf32, #tpu.memory_space<vmem>>, vector<8x32xf32>
    %96 = arith.truncf %95 : vector<8x32xf32> to vector<8x32xbf16>
    %c0_40 = arith.constant 0 : index
    %c0_41 = arith.constant 0 : index
    %97 = vector.load %arg9[%c0_40, %c0_41] : memref<32x32xbf16, #tpu.memory_space<vmem>>, vector<32x32xbf16>
    %cst_42 = arith.constant dense<0.000000e+00> : vector<8x32xf32>
    %98 = tpu.matmul %96, %97, %cst_42 {dimension_numbers = #tpu.dot_dimension_numbers<[1], [0], [0], [1], [0, 0, 1, 1], [], []>} : vector<8x32xbf16>, vector<32x32xbf16>, vector<8x32xf32> -> vector<8x32xf32>
    %c0_43 = arith.constant 0 : index
    %c0_44 = arith.constant 0 : index
    %99 = vector.load %arg10[%c0_43, %c0_44] : memref<1x32xf32, #tpu.memory_space<vmem>>, vector<1x32xf32>
    %100 = vector.broadcast %99 : vector<1x32xf32> to vector<8x32xf32>
    %101 = arith.addf %98, %100 : vector<8x32xf32>
    %102 = arith.addf %101, %3 : vector<8x32xf32>
    %c0_45 = arith.constant 0 : index
    %c0_46 = arith.constant 0 : index
    %c0_47 = arith.constant 0 : index
    %103 = vector.load %arg11[%c0_45, %c0_46, %c0_47] : memref<1x8x32xf32, #tpu.memory_space<vmem>>, vector<1x8x32xf32>
    %104 = vector.shape_cast %103 : vector<1x8x32xf32> to vector<8x32xf32>
    %105 = vector.shape_cast %102 : vector<8x32xf32> to vector<1x8x32xf32>
    tpu.vector_store %arg11[%c0_45, %c0_46, %c0_47], %105 {strides = array<i32>} : memref<1x8x32xf32, #tpu.memory_space<vmem>>, vector<1x8x32xf32>,
    return
  }
  func.func @transform_0(%arg0: i32, %arg1: i32) -> (i32, i32, i32) {
    %c0_i32 = arith.constant 0 : i32
    %c0_i32_0 = arith.constant 0 : i32
    %c0_i32_1 = arith.constant 0 : i32
    return %arg0, %c0_i32, %c0_i32_0 : i32, i32, i32
  }
  func.func @transform_1(%arg0: i32, %arg1: i32) -> (i32, i32, i32) {
    %c0_i32 = arith.constant 0 : i32
    %c0_i32_0 = arith.constant 0 : i32
    return %arg0, %arg1, %c0_i32 : i32, i32, i32
  }
  func.func @transform_2(%arg0: i32, %arg1: i32) -> (i32, i32, i32) {
    %c0_i32 = arith.constant 0 : i32
    %c0_i32_0 = arith.constant 0 : i32
    return %arg0, %arg1, %c0_i32 : i32, i32, i32
  }
  func.func @transform_3(%arg0: i32, %arg1: i32) -> (i32, i32) {
    %c0_i32 = arith.constant 0 : i32
    %c0_i32_0 = arith.constant 0 : i32
    %c0_i32_1 = arith.constant 0 : i32
    return %c0_i32, %c0_i32_0 : i32, i32
  }
  func.func @transform_4(%arg0: i32, %arg1: i32) -> (i32, i32) {
    %c0_i32 = arith.constant 0 : i32
    %c0_i32_0 = arith.constant 0 : i32
    %c0_i32_1 = arith.constant 0 : i32
    return %c0_i32, %c0_i32_0 : i32, i32
  }
  func.func @transform_5(%arg0: i32, %arg1: i32) -> (i32, i32) {
    %c0_i32 = arith.constant 0 : i32
    %c0_i32_0 = arith.constant 0 : i32
    %c0_i32_1 = arith.constant 0 : i32
    return %c0_i32, %c0_i32_0 : i32, i32
  }
  func.func @transform_6(%arg0: i32, %arg1: i32) -> (i32, i32) {
    %c0_i32 = arith.constant 0 : i32
    %c0_i32_0 = arith.constant 0 : i32
    %c0_i32_1 = arith.constant 0 : i32
    return %c0_i32, %c0_i32_0 : i32, i32
  }
  func.func @transform_7(%arg0: i32, %arg1: i32) -> (i32, i32) {
    %c0_i32 = arith.constant 0 : i32
    %c0_i32_0 = arith.constant 0 : i32
    %c0_i32_1 = arith.constant 0 : i32
    return %c0_i32, %c0_i32_0 : i32, i32
  }
  func.func @transform_8(%arg0: i32, %arg1: i32) -> (i32, i32) {
    %c0_i32 = arith.constant 0 : i32
    %c0_i32_0 = arith.constant 0 : i32
    %c0_i32_1 = arith.constant 0 : i32
    return %c0_i32, %c0_i32_0 : i32, i32
  }
  func.func @transform_9(%arg0: i32, %arg1: i32) -> (i32, i32, i32) {
    %c0_i32 = arith.constant 0 : i32
    %c0_i32_0 = arith.constant 0 : i32
    return %arg0, %arg1, %c0_i32 : i32, i32, i32
  }
}

</mosaic_0001>

<bundles_post_ra>
// kernel: tpu_custom_call.1
= control target key start
LH: loop header
LB: loop body
LE: loop exit
PB: predicated region body
PF: predicated region fallthrough
CT: control target
= control target key end

     0   :  { %s2003_s0 = inlined_call_operand.hbm [shape: f32[2,8,32], index: 0, kind: input, shape index: {}]   ;;  %s2004_s1 = inlined_call_operand.hbm [shape: f32[2,8,32], index: 1, kind: input, shape index: {}]   ;;  %s2005_s2 = inlined_call_operand.hbm [shape: f32[2,8,8], index: 2, kind: input, shape index: {}]   ;;  %s2006_s3 = inlined_call_operand.hbm [shape: bf16[32,32], index: 3, kind: input, shape index: {}]   ;;  %s2007_s4 = inlined_call_operand.vmem [shape: f32[1,32], index: 4, kind: input, shape index: {}]   ;;  %s2008_s5 = inlined_call_operand.vmem [shape: bf16[32,64], index: 5, kind: input, shape index: {}]   ;;  %s2009_s6 = inlined_call_operand.vmem [shape: f32[1,64], index: 6, kind: input, shape index: {}]   ;;  %s2010_s7 = inlined_call_operand.hbm [shape: bf16[32,32], index: 7, kind: input, shape index: {}]   ;;  %s2011_s8 = inlined_call_operand.vmem [shape: f32[1,32], index: 8, kind: input, shape index: {}]   ;;  %s2012_s9 = inlined_call_operand.hbm [shape: f32[2,8,32], index: 9, kind: output, shape index: {}]  }
   0x1   :  { %2034 = sst [smem:[#allocation23_spill]] %s2004_s1 }
   0x2   :  { %2035 = sst [smem:[#allocation24_spill]] %s2006_s3 }
   0x3   :  { %2036 = sst [smem:[#allocation25_spill]] %s2010_s7 }
   0x4   :  { %2037 = sst [smem:[#allocation26_spill]] %s2012_s9 }
   0x5   :  { %14 = vsyncpa [#allocation4], 0 }
   0x6   :  { %16 = vsyncpa [#allocation4 + $0x1], 0 }
   0x7   :  { %17 = vsyncpa [#allocation7], 0 }
   0x8   :  { %19 = vsyncpa [#allocation7 + $0x1], 0 }
   0x9   :  { %20 = vsyncpa [#allocation10], 0 }
   0xa   :  { %21 = vsyncpa [#allocation5], 0 }
   0xb   :  { %23 = vsyncpa [#allocation5 + $0x1], 0  ;;  %s1617_s30 = smov 0   ;;  %s1619_s10 = smov 0  }
   0xc   :  { %s1621_s11 = smov 0   ;;  %s1623_s12 = smov 0  }
   0xd   :  { %s1625_s13 = smov 0   ;;  %s1627_s14 = smov 0  }
   0xe LB: > { %2038 = sst [smem:[#allocation17_spill]] %s1531_s30  ;;  %s1648_s15 = sadd.s32 4294967295, %s1551_s14   ;;  %s1551_s14 = sphi %s1627_s14, %s29_s14   ;;  %s1547_s13 = sphi %s1625_s13, %s2077_s13   ;;  %s1543_s12 = sphi %s1623_s12, %s2076_s12   ;;  %s1539_s11 = sphi %s1621_s11, %s2080_s11   ;;  %s1535_s10 = sphi %s1619_s10, %s2079_s10   ;;  %s1531_s30 = sphi %s1617_s30, %s2078_s30  }
   0xf   : > { %2039 = sst [smem:[#allocation18_spill]] %s1547_s13  ;;  %s1093_s16 = sadd.s32 4294967294, %s1551_s14  }
  0x10   : > { %2040 = sst [smem:[#allocation19_spill]] %s1551_s14  ;;  %p61_p0 = scmp.ne.s32.totalorder %s1535_s10, %s1531_s30 }
  0x11   : > { %p2013_p1 = scmp.eq.s32.totalorder %s1648_s15, 0  ;;  %p275_p3 = scmp.eq.s32.totalorder %s1093_s16, 1 }
  0x12   : > { %p1094_p5 = scmp.ge.s32.totalorder %s1551_s14, 1  ;;  %p282_p7 = scmp.lt.s32.totalorder %s1551_s14, 3 }
  0x13   : > { %p1657_p4 = por %p2013_p1, %p61_p0  ;;  %p1662_p6 = por %p275_p3, %p61_p0 }
  0x14   : > { %p1667_p8 = pnand %p1094_p5, %p282_p7  ;;  %s1553_s20 = smov [#allocation9]  }
  0x15   : > { %s2041_s17 = scalar_select %p1657_p4, 1, 0 }
  0x16   : > { %s2042_s18 = scalar_select %p1662_p6, 1, 0 }
  0x17   : > { %s2044_s19 = scalar_select %p1667_p8, 1, 0 }
  0x18   : > { %2043 = sst [smem:[#allocation20_spill]] %s2042_s18  ;;  %s294_s21 = sshll.u32 %s1553_s20, 4  ;;  %s295_s21 = int_to_ptr.vmem [resolvable:$true] %s294_s21 }
  0x19   : > { %p1212_p9 = pneg %p1667_p8  ;;  %s41_s23 = sadd.s32 1, %s1547_s13 }
  0x1a   : > { %s2046_s3 = sld [smem:[#allocation24_spill]] }
  0x1b   : > { %p1676_p11 = pnand %p1212_p9, %p2013_p1 }
  0x1d   : > { %s2045_s22 = scalar_select %p1676_p11, 1, 0 }
  0x1e   : > { %p2026_p13 = pneg %p1676_p11 }
  0x20   : > { %s1315_s26 = scalar_lea.hbm %s2046_s3, 256 }
  0x21   : > { %p1316_p12 = scmp.ne.s32.totalorder %s2046_s3, %s1315_s26  ;;  %p1322_p5 = scmp.lt.u32.totalorder %s1315_s26, %s2046_s3 }
  0x23   : > { %p1318_p0 = pnand %p2026_p13, %p1316_p12 }
  0x25   : > { %p1319_p3 = pneg %p1318_p0 }
  0x27   : > { %p1324_p7 = pnand %p1322_p5, %p1319_p3 }
  0x29   : > { %1327 = shalt.err (!%p1324_p7)
}
  0x2a   : > { %s1328_s20 = scalar_lea.vmem %s295_s21, 256  ;;  %p1336_p2 = scmp.lt.s32.totalorder %s295_s21, %s295_s21 }
  0x2b   : > { %p1329_p9 = scmp.ne.s32.totalorder %s295_s21, %s1328_s20  ;;  %p1337_p6 = scmp.lt.s32.totalorder %s1328_s20, %s1328_s20 }
  0x2d   : > { %p1331_p10 = pnand %p1329_p9, %p2026_p13  ;;  %p1338_p4 = por %p1337_p6, %p1336_p2 }
  0x2f   : > { %p1332_p1 = pneg %p1331_p10 }
  0x31   : > { %p1339_p8 = pnand %p1338_p4, %p1332_p1 }
  0x33   : > { %1342 = shalt.err (!%p1339_p8)
}
  0x34   : > { %s2016_s24 = smov 64   ;;  %s2017_s25 = smov 4  }
  0x35   : > { %1215 = dma.hbm_to_vmem [thread:$0]  (!%p1676_p11), %s2046_s3, 256, %s295_s21, [#allocation10], %s2016_s24, %s2016_s24, %s2017_s25  }
  0x36   : > { %p43_p1 = scmp.ge.s32.totalorder %s41_s23, 2  ;;  %s48_s28 = sadd.s32 1, %s1539_s11 }
  0x37   : > { %p55_p2 = scmp.ne.s32.totalorder %s1539_s11, %s1535_s10  ;;  %p56_p4 = scmp.eq.s32.totalorder %s1551_s14, 0 }
  0x38   : > { %s2082_s23 = smov (%p43_p1, %s41_s23), 0  ;;  %p2048_p8 = scmp.eq.s32.totalorder %s1648_s15, 1 }
  0x39   : > { %2047 = sst [smem:[#allocation21_spill]] %s2082_s23  ;;  %p57_p6 = por %p56_p4, %p55_p2 }
  0x3a   : > { %p1714_p10 = por %p2048_p8, %p55_p2  ;;  %s45_s16 = ssub.s32 %s1547_s13, %s2082_s23 }
  0x3b   : > { %p1235_p12 = scmp.lt.s32.totalorder %s1551_s14, 2  ;;  %p46_p0 = scmp.eq.s32.totalorder %s45_s16, 0 }
  0x3c   : > { %s2049_s29 = scalar_select %p1714_p10, 1, 0 }
  0x3d   : > { %s2019_s20 = sand.u32 1, %s1539_s11   ;;  %s1727_s26 = sshll.u32 %s1547_s13, 7 }
  0x3e   : > { %s1724_s21 = sshll.u32 %s2019_s20, 3  ;;  %p1732_p3 = pnand %p1235_p12, %p57_p6 }
  0x3f   : > { %s1730_s27 = scalar_select %p46_p0, %s1539_s11, %s48_s28  }
  0x40   : > { %s2051_s24 = scalar_select %p1732_p3, 1, 0 }
  0x41   : > { %2050 = sst [smem:[#allocation22_spill]] %s1730_s27  ;;  %s351_s25 = sand.u32 1, %s1551_s14  }
  0x42   : > { %s2052_s1 = sld [smem:[#allocation23_spill]]  ;;  %s355_s20 = scalar_lea.vmem [#allocation6], %s1724_s21 }
  0x43   : > { %s363_s13 = sshll.u32 %s355_s20, 4  ;;  %s1556_s28 = smov [#allocation11]   ;;  %s1744_s13 = int_to_ptr.vmem [resolvable:$true] %s363_s13 }
  0x44   : > { %s1746_s27 = sshll.u32 %s1556_s28, 4  ;;  %s1748_s18 = scalar_lea.sflag [#allocation7], %s351_s25  ;;  %s317_s27 = int_to_ptr.vmem [resolvable:$true] %s1746_s27 }
  0x45   : > { %p1754_p7 = pneg %p1732_p3 }
  0x47   : > { %s2053_s3 = scalar_select %p1754_p7, 1, 0 }
  0x48   : > { %s1741_s16 = scalar_lea.hbm %s2052_s1, %s1727_s26  ;;  %s1348_s14 = scalar_lea.hbm %s2052_s1, 256 }
  0x49   : > { %s1343_s30 = scalar_lea.hbm %s1741_s16, 128  ;;  %p1349_p2 = scmp.lt.u32.totalorder %s1741_s16, %s2052_s1 }
  0x4a   : > { %p1344_p5 = scmp.ne.s32.totalorder %s1741_s16, %s1343_s30  ;;  %p1350_p4 = scmp.lt.u32.totalorder %s1348_s14, %s1343_s30 }
  0x4b   : > { %p1352_p8 = scmp.lt.u32.totalorder %s1343_s30, %s1741_s16 }
  0x4c   : > { %p1346_p9 = pnand %p1754_p7, %p1344_p5  ;;  %p1351_p6 = por %p1350_p4, %p1349_p2 }
  0x4e   : > { %p1347_p1 = pneg %p1346_p9  ;;  %p1353_p12 = por %p1352_p8, %p1351_p6 }
  0x50   : > { %p1354_p0 = pnand %p1353_p12, %p1347_p1 }
  0x52   : > { %1357 = shalt.err (!%p1354_p0)
}
  0x53   : > { %s1358_s25 = scalar_lea.vmem %s1744_s13, 128  ;;  %s1557_s23 = smov [#allocation6]  }
  0x54   : > { %p1359_p5 = scmp.ne.s32.totalorder %s1744_s13, %s1358_s25  ;;  %s1363_s20 = sshll.u32 %s1557_s23, 4  ;;  %s1364_s20 = int_to_ptr.vmem [resolvable:$false] %s1363_s20 }
  0x55   : > { %s1365_s9 = scalar_lea.vmem %s1364_s20, 256  ;;  %p1366_p10 = scmp.lt.s32.totalorder %s1744_s13, %s1364_s20 }
  0x56   : > { %p1361_p9 = pnand %p1359_p5, %p1754_p7  ;;  %p1367_p11 = scmp.lt.s32.totalorder %s1365_s9, %s1358_s25 }
  0x58   : > { %p1362_p13 = pneg %p1361_p9  ;;  %p1368_p2 = por %p1367_p11, %p1366_p10 }
  0x5a   : > { %p1369_p4 = pnand %p1368_p2, %p1362_p13 }
  0x5c   : > { %1372 = shalt.err (!%p1369_p4)
}
  0x5d   : > { %1225 = dma.hbm_to_vmem [thread:$0]  (!%p1732_p3), %s1741_s16, 128, %s1744_s13, %s1748_s18  }
  0x5e   : > { %s2054_s7 = sld [smem:[#allocation25_spill]]  ;;  %p2055_p11 = scmp.ne.s32.totalorder %s2045_s22, 0 }
  0x60   : > { %p2056_p13 = pneg %p2055_p11 }
  0x64   : > { %s1373_s28 = scalar_lea.hbm %s2054_s7, 256 }
  0x65   : > { %p1374_p1 = scmp.ne.s32.totalorder %s2054_s7, %s1373_s28  ;;  %p1380_p8 = scmp.lt.u32.totalorder %s1373_s28, %s2054_s7 }
  0x67   : > { %p1376_p10 = pnand %p1374_p1, %p2056_p13 }
  0x69   : > { %p1377_p6 = pneg %p1376_p10 }
  0x6b   : > { %p1382_p12 = pnand %p1380_p8, %p1377_p6 }
  0x6d   : > { %1385 = shalt.err (!%p1382_p12)
}
  0x6e   : > { %s1386_s13 = scalar_lea.vmem %s317_s27, 256  ;;  %p2057_p5 = pmov %p2056_p13 }
  0x6f   : > { %p1387_p0 = scmp.ne.s32.totalorder %s317_s27, %s1386_s13  ;;  %p1394_p4 = scmp.lt.s32.totalorder %s317_s27, %s317_s27 }
  0x70   : > { %p1395_p3 = scmp.lt.s32.totalorder %s1386_s13, %s1386_s13 }
  0x71   : > { %p1389_p9 = pnand %p1387_p0, %p2057_p5 }
  0x72   : > { %p1396_p7 = por %p1395_p3, %p1394_p4 }
  0x73   : > { %p1390_p2 = pneg %p1389_p9 }
  0x75   : > { %p1397_p1 = pnand %p1396_p7, %p1390_p2 }
  0x77   : > { %1400 = shalt.err (!%p1397_p1)
}
  0x78   : > { %s2058_s1 = smov 4   ;;  %s2059_s16 = smov 64  }
  0x79   : > { %1218 = dma.hbm_to_vmem [thread:$0]  (!%p2055_p11), %s2054_s7, 256, %s317_s27, [#allocation10], %s2059_s16, %s2059_s16, %s2058_s1  }
  0x7a   : > { %s1806_s23 = scalar_lea.hbm %s2003_s0, %s1727_s26  ;;  %s337_s22 = scalar_lea.vmem [#allocation3], %s1724_s21 }
  0x7b   : > { %s344_s25 = sshll.u32 %s337_s22, 4  ;;  %s1815_s9 = scalar_lea.hbm %s2005_s2, %s1727_s26  ;;  %s1809_s25 = int_to_ptr.vmem [resolvable:$true] %s344_s25 }
  0x7c   : > { %s2060_s30 = sand.u32 1, %s1539_s11   ;;  %s1401_s1 = scalar_lea.hbm %s1806_s23, 128 }
  0x7d   : > { %s334_s27 = scalar_lea.sflag [#allocation4], %s2060_s30  ;;  %p1402_p3 = scmp.ne.s32.totalorder %s1806_s23, %s1401_s1 }
  0x7e   : > { %p2061_p7 = scmp.ne.s32.totalorder %s2053_s3, 0  ;;  %s1406_s28 = scalar_lea.hbm %s2003_s0, 256 }
  0x7f   : > { %p1407_p10 = scmp.lt.u32.totalorder %s1806_s23, %s2003_s0  ;;  %p1408_p6 = scmp.lt.u32.totalorder %s1406_s28, %s1401_s1 }
  0x80   : > { %p1404_p11 = pnand %p1402_p3, %p2061_p7  ;;  %p1410_p12 = scmp.lt.u32.totalorder %s1401_s1, %s1806_s23 }
  0x81   : > { %p1409_p8 = por %p1408_p6, %p1407_p10 }
  0x82   : > { %p1405_p13 = pneg %p1404_p11 }
  0x83   : > { %p1411_p0 = por %p1410_p12, %p1409_p8 }
  0x85   : > { %p1412_p5 = pnand %p1411_p0, %p1405_p13 }
  0x87   : > { %1415 = shalt.err (!%p1412_p5)
}
  0x88   : > { %s1416_s26 = scalar_lea.vmem %s1809_s25, 128  ;;  %s1558_s20 = smov [#allocation3]  }
  0x89   : > { %p1417_p9 = scmp.ne.s32.totalorder %s1809_s25, %s1416_s26  ;;  %s1421_s13 = sshll.u32 %s1558_s20, 4  ;;  %s1422_s13 = int_to_ptr.vmem [resolvable:$false] %s1421_s13 }
  0x8a   : > { %s1423_s7 = scalar_lea.vmem %s1422_s13, 256  ;;  %p1424_p1 = scmp.lt.s32.totalorder %s1809_s25, %s1422_s13 }
  0x8b   : > { %p1419_p2 = pnand %p1417_p9, %p2061_p7  ;;  %p1425_p3 = scmp.lt.s32.totalorder %s1423_s7, %s1416_s26 }
  0x8d   : > { %p1420_p4 = pneg %p1419_p2  ;;  %p1426_p11 = por %p1425_p3, %p1424_p1 }
  0x8f   : > { %p1427_p10 = pnand %p1426_p11, %p1420_p4 }
  0x91   : > { %1430 = shalt.err (!%p1427_p10)
}
  0x92   : > { %p2062_p13 = scmp.ne.s32.totalorder %s2051_s24, 0  ;;  %s374_s30 = scalar_lea.vmem [#allocation8], %s1724_s21 }
  0x93   : > { %s382_s1 = sshll.u32 %s374_s30, 4  ;;  %s1431_s16 = scalar_lea.hbm %s1815_s9, 128  ;;  %s383_s1 = int_to_ptr.vmem [resolvable:$true] %s382_s1 }
  0x94   : > { %1222 = dma.hbm_to_vmem [thread:$0]  (!%p2062_p13), %s1806_s23, 128, %s1809_s25, %s334_s27  }
  0x95   : > { %p1432_p6 = scmp.ne.s32.totalorder %s1815_s9, %s1431_s16  ;;  %s1436_s22 = scalar_lea.hbm %s2005_s2, 256 }
  0x96   : > { %p1437_p0 = scmp.lt.u32.totalorder %s1815_s9, %s2005_s2  ;;  %p1438_p5 = scmp.lt.u32.totalorder %s1436_s22, %s1431_s16 }
  0x97   : > { %p1434_p8 = pnand %p1432_p6, %p2061_p7  ;;  %p1440_p2 = scmp.lt.u32.totalorder %s1431_s16, %s1815_s9 }
  0x98   : > { %p1439_p9 = por %p1438_p5, %p1437_p0 }
  0x99   : > { %p1435_p12 = pneg %p1434_p8 }
  0x9a   : > { %p1441_p4 = por %p1440_p2, %p1439_p9 }
  0x9c   : > { %p1442_p1 = pnand %p1441_p4, %p1435_p12 }
  0x9e   : > { %1445 = shalt.err (!%p1442_p1)
}
  0x9f   : > { %s1446_s21 = scalar_lea.vmem %s383_s1, 128  ;;  %s1559_s23 = smov [#allocation8]  }
  0xa0   : > { %p1447_p3 = scmp.ne.s32.totalorder %s383_s1, %s1446_s21  ;;  %s1451_s25 = sshll.u32 %s1559_s23, 4  ;;  %s1452_s25 = int_to_ptr.vmem [resolvable:$false] %s1451_s25 }
  0xa1   : > { %s1453_s27 = scalar_lea.vmem %s1452_s25, 256  ;;  %p1454_p6 = scmp.lt.s32.totalorder %s383_s1, %s1452_s25 }
  0xa2   : > { %p1449_p11 = pnand %p1447_p3, %p2061_p7  ;;  %p1455_p8 = scmp.lt.s32.totalorder %s1453_s27, %s1446_s21 }
  0xa4   : > { %p1450_p10 = pneg %p1449_p11  ;;  %p1456_p13 = por %p1455_p8, %p1454_p6 }
  0xa6   : > { %p1457_p0 = pnand %p1456_p13, %p1450_p10 }
  0xa8   : > { %1460 = shalt.err (!%p1457_p0)
}
  0xa9   : > { %p2063_p5 = scmp.ne.s32.totalorder %s2051_s24, 0  ;;  %p2064_p12 = scmp.ne.s32.totalorder %s2044_s19, 0 }
  0xaa   : > { %s1862_s3 = sand.u32 (!%p2064_p12), 1, %s1535_s10   ;;  %p2065_p7 = scmp.ne.s32.totalorder (!%p2064_p12), %s2041_s17, 0 }
  0xab   : > { %1228 = dma.hbm_to_vmem [thread:$0]  (!%p2063_p5), %s1815_s9, 128, %s383_s1, %s1748_s18  }
  0xac   : > { %391 = sbr.rel (%p2064_p12) target bundleno = 1934 (0x78e), region = 56  ;;  %s1865_s13 = sshll.u32 (!%p2064_p12), %s1862_s3, 3 }
  0xad   : > { %s394_s7 = scalar_lea.sflag (!%p2064_p12), [#allocation4], %s1862_s3  ;;  %s397_s30 = scalar_lea.vmem (!%p2064_p12), [#allocation3], %s1865_s13 }
  0xb3   : > { %1514 = dma.done.wait (%p2065_p7), %s394_s7, 128  }
  0xb4   : > { %1516 = vsyncadd (%p2065_p7), %s394_s7, 4294967168  ;;  %s402_s18 = sand.u32 1, %s1648_s15   ;;  %s406_s24 = scalar_lea.vmem [#allocation6], %s1865_s13 }
  0xb5   : > { %s403_s19 = scalar_lea.sflag [#allocation7], %s402_s18 }
  0xb6   : > { %1518 = dma.done.wait (%p2065_p7), %s403_s19, 256  }
  0xb7   : > { %1520 = vsyncadd (%p2065_p7), %s403_s19, 4294967040  ;;  %s415_s9 = scalar_lea.vmem [#allocation8], %s1865_s13  ;;  %p2066_p13 = scmp.eq.s32.totalorder %s1648_s15, 0 }
  0xb9   : > { %1522 = dma.done.wait (%p2066_p13), [#allocation10], 512   ;;  %p2067_p9 = pmov %p2066_p13 }
  0xba   : > { %vm472_vm0 = vcmask 261120   ;;  %v469_v0 = vld [vmem:[%s397_s30] sm:$0xff]  ;;  %v1884_v1 = vld [vmem:[%s406_s24] sm:$0xff]  ;;  %v1560_v16 = vmov 0.0   ;;  %vm1561_vm1 = vmmov 0   ;;  %vm636_vm2 = vcmask 130048  }
  0xbb   : > { %1524 = vsyncadd (%p2067_p9), [#allocation10], 4294966784  ;;  %v488_v2 = vsel %vm472_vm0, %v469_v0, 0.0  ;;  %v473_v3 = vsel %vm472_vm0, %v1884_v1, 0.0  ;;  %v1297_v14 = vld [vmem:[%s2008_s5] sm:$0xff]   ;;  %v1298_v15 = vld [vmem:[#allocation9] sm:$0xff]   ;;  %1156 = vmatprep.subr.bf16.mxu1 %v1560_v16  ;;  %1148 = vmatprep.subr.bf16.mxu0 %v1560_v16 }
  0xbc   : > { %489 = vadd.xlane.f32.xlu0 %v488_v2  ;;  %1157 = vmatpush3.bf16.msra.mxu1 %v1297_v14  ;;  %v1299_v17 = vld [vmem:[%s2008_s5 + $0x8] sm:$0xff]   ;;  %v1300_v18 = vld [vmem:[#allocation9 + $0x8] sm:$0xff]   ;;  %s1562_s20 = smov 112   ;;  %vm683_vm3 = vcmask 64512   ;;  %s1563_s21 = smov 96   ;;  %vm702_vm4 = vcmask 1043456  }
  0xbd   : > { %1149 = vmatpush3.bf16.msra.mxu0 %v1298_v15  ;;  %1158 = vmatprep.subr.bf16.mxu1 %v1560_v16  ;;  %v1115_v31 = vld [vmem:[%s2009_s6] ss:$0 sm:$0xff]  ;;  %v471_v49 = vld [vmem:[%s415_s9] sm:$0xff]  ;;  %s1564_s23 = smov 80   ;;  %s1565_s25 = smov 16   ;;  %vm862_vm5 = vcmask 261248  }
  0xbe   : > { %1160 = vmatprep.mubr.msk.bf16.mxu1 %vm1561_vm1, %v1560_v16  ;;  %1150 = vmatprep.subr.bf16.mxu0 %v1560_v16  ;;  %v1111_v36 = vld [vmem:[%s2007_s4] ss:$0 sm:$0xff]  ;;  %s1128_s30 = sshll.u32 %s1543_s12, 7  ;;  %s467_s18 = scalar_lea.vmem [#allocation12], %s1865_s13 }
  0xbf   : > { %1152 = vmatprep.mubr.msk.bf16.mxu0 %vm1561_vm1, %v1560_v16  ;;  %s949_s19 = sshll.u32 %s467_s18, 4  ;;  %s2068_s15 = sld [smem:[#allocation26_spill]]  ;;  %s1955_s19 = int_to_ptr.vmem [resolvable:$true] %s949_s19 }
  0xc0   : > { %474 = vadd.xlane.f32.xlu0 %v473_v3  ;;  %1159 = vmatpush3.bf16.msra.mxu1 %v1299_v17  ;;  %s935_s12 = scalar_lea.sflag [#allocation5], %s1862_s3  ;;  %s1461_s13 = scalar_lea.vmem %s1955_s19, 128 }
  0xc1   : > { %1170 = vmatprep.subr.bf16.mxu1 %v1560_v16  ;;  %1151 = vmatpush3.bf16.msra.mxu0 %v1300_v18  ;;  %p1462_p2 = scmp.ne.s32.totalorder %s1955_s19, %s1461_s13  ;;  %p2069_p4 = scmp.ne.s32.totalorder %s2049_s29, 0 }
  0xc2   : > { %1164 = vmatprep.subr.bf16.mxu0 %v1560_v16  ;;  %s1566_s1 = smov [#allocation12]  }
  0xc3   : > { %p1463_p1 = pnand %p1462_p2, %p2069_p4  ;;  %s1465_s16 = sshll.u32 %s1566_s1, 4  ;;  %s1466_s16 = int_to_ptr.vmem [resolvable:$false] %s1465_s16 }
  0xc4   : > { %s1467_s14 = scalar_lea.vmem %s1466_s16, 256  ;;  %p1468_p11 = scmp.lt.s32.totalorder %s1955_s19, %s1466_s16 }
  0xc5   : > { %s1953_s17 = scalar_lea.hbm %s2068_s15, %s1128_s30  ;;  %p1464_p3 = pneg %p1463_p1 }
  0xc6   : > { %p1469_p10 = scmp.lt.s32.totalorder %s1467_s14, %s1461_s13 }
  0xc8   : > { %p1470_p6 = por %p1469_p10, %p1468_p11 }
  0xca   : > { %p1471_p8 = pnand %p1470_p6, %p1464_p3 }
 0x149   : > { %v490_v4 = vpop.xlane.xlu0 %489 }
 0x14a   : > { %v491_v5 = vmul.f32 0.03125, %v490_v4 }
 0x14c   : > { %v492_v6 = vsub.f32 %v469_v0, %v491_v5 }
 0x14d   : > { %v475_v7 = vpop.xlane.xlu0 %474 }
 0x14e   : > { %v477_v8 = vmul.f32 0.03125, %v475_v7  ;;  %v493_v9 = vmul.f32 %v492_v6, %v492_v6 }
 0x150   : > { %v478_v10 = vsub.f32 %v1884_v1, %v477_v8  ;;  %v494_v11 = vsel %vm472_vm0, %v493_v9, 0.0 }
 0x151   : > { %495 = vadd.xlane.f32.xlu1 %v494_v11 }
 0x152   : > { %v479_v12 = vmul.f32 %v478_v10, %v478_v10 }
 0x154   : > { %v480_v13 = vsel %vm472_vm0, %v479_v12, 0.0 }
 0x155   : > { %481 = vadd.xlane.f32.xlu1 %v480_v13 }
 0x1de   : > { %v496_v19 = vpop.xlane.xlu1 %495 }
 0x1df   : > { %v497_v20 = vmul.f32 0.03125, %v496_v19 }
 0x1e1   : > { %v498_v21 = vadd.f32 1e-05, %v497_v20 }
 0x1e2   : > { %v482_v22 = vpop.xlane.xlu1 %481 }
 0x1e3   : > { %1303 = vrsqrt.f32 %v498_v21  ;;  %v483_v23 = vmul.f32 0.03125, %v482_v22 }
 0x1e5   : > { %v484_v24 = vadd.f32 1e-05, %v483_v23 }
 0x1e7   : > { %1305 = vrsqrt.f32 %v484_v24 }
 0x1ed   : > { %v1304_v25 = vpop.eup %1303 }
 0x1ee   : > { %v500_v26 = vmul.f32 %v1304_v25, %v492_v6 }
 0x1f0   : > { %v501_v27 = vpack.c.bf16 %v500_v26, %v500_v26  ;;  %v1301_v26 = vld [vmem:[#allocation11] sm:$0xff]  }
 0x1f1   : > { %v1306_v28 = vpop.eup %1305 }
 0x1f2   : > { %1161 = vmatmul.mubr.msk.bf16.vlgmr.msra.gmra.mrb[0].mxu1 %vm472_vm0, %v501_v27  ;;  %v486_v29 = vmul.f32 %v1306_v28, %v478_v10  ;;  %v1302_v27 = vld [vmem:[#allocation11 + $0x8] sm:$0xff]  }
 0x1f3   : > { %1172 = vmatprep.mubr.msk.bf16.mxu1 %vm1561_vm1, %v1560_v16 }
 0x1f4   : > { %v487_v30 = vpack.c.bf16 %v486_v29, %v486_v29 }
 0x1f6   : > { %1153 = vmatmul.mubr.msk.bf16.vlgmr.msra.gmra.mrb[0].mxu0 %vm472_vm0, %v487_v30 }
 0x1f7   : > { %1166 = vmatprep.mubr.msk.bf16.mxu0 %vm1561_vm1, %v1560_v16 }
 0x2c5   : > { %v628_v32 = vpop.f32.mrb[0].mxu1 }
 0x2c6   : > { %v629_v33 = vadd.f32 %v1115_v31, %v628_v32  ;;  %v1162_v34 = vpop.f32.mrb[1].mxu1 }
 0x2c7   : > { %v631_v35 = vpop.f32.mrb[2].mxu1 }
 0x2c8   : > { %v635_v37 = vpack.c.bf16 %v629_v33, %v629_v33  ;;  %v1163_v38 = vpop.f32.mrb[3].mxu1 }
 0x2c9   : > { %v562_v39 = vpop.f32.mrb[0].mxu0 }
 0x2ca   : > { %v563_v40 = vadd.f32 %v1111_v36, %v562_v39  ;;  %750 = vrot.lane.b32.xlu0 %v635_v37, %s1562_s20  ;;  %v1154_v41 = vpop.f32.mrb[1].mxu0  ;;  %v641_v42 = vsel %vm636_vm2, %v635_v37, 0 }
 0x2cb   : > { %v565_v43 = vpop.f32.mrb[2].mxu0  ;;  %1165 = vmatpush3.bf16.xpose.msra.mxu0 %v641_v42 }
 0x2cc   : > { %v634_v44 = vpack.c.bf16 %v563_v40, %v563_v40  ;;  %v1155_v45 = vpop.f32.mrb[3].mxu0  ;;  %1176 = vmatprep.subr.bf16.mxu0 %v1560_v16 }
 0x2ce   : > { %748 = vrot.lane.b32.xlu1 %v634_v44, %s1562_s20 }
 0x2d2   : > { %1167 = vmatmul.mubr.msk.bf16.vlgmr.msra.gmra.mrb[4].mxu0 %vm636_vm2, %v634_v44 }
 0x2d3   : > { %1178 = vmatprep.mubr.msk.bf16.mxu0 %vm1561_vm1, %v1560_v16 }
 0x33c   : > { %v751_v46 = vpop.permute.xlu0 %750 }
 0x33d   : > { %v756_v47 = vsel %vm636_vm2, %v751_v46, 0 }
 0x33e   : > { %1177 = vmatpush3.bf16.xpose.msra.mxu0 %v756_v47 }
 0x33f   : > { %1188 = vmatprep.subr.bf16.mxu0 %v1560_v16 }
 0x340   : > { %v749_v48 = vpop.permute.xlu1 %748 }
 0x345   : > { %1179 = vmatmul.mubr.msk.bf16.vlgmr.msra.gmra.mrb[8].mxu0 %vm636_vm2, %v749_v48 }
 0x346   : > { %1192 = vmatprep.mubr.msk.bf16.mxu0 %vm1561_vm1, %v1560_v16  ;;  %1189 = vmatpush3.bf16.msra.mxu0 %v1301_v26 }
 0x347   : > { %1190 = vmatprep.subr.bf16.mxu0 %v1560_v16 }
 0x34a   : > { %1191 = vmatpush3.bf16.msra.mxu0 %v1302_v27 }
 0x3a5   : > { %v677_v50 = vpop.f32.mrb[4].mxu0 }
 0x3a6   : > { %v678_v51 = vadd.f32 %v677_v50, %v471_v49  ;;  %v1168_v52 = vpop.f32.mrb[5].mxu0 }
 0x3a7   : > { %v680_v53 = vpop.f32.mrb[6].mxu0 }
 0x3a8   : > { %v1169_v54 = vpop.f32.mrb[7].mxu0  ;;  %v684_v55 = vsel %vm683_vm3, %v678_v51, -inf }
 0x3a9   : > { %685 = vmax.xlane.f32.xlu1 %v684_v55 }
 0x418   : > { %v792_v56 = vpop.f32.mrb[8].mxu0 }
 0x419   : > { %v793_v57 = vadd.f32 %v792_v56, %v471_v49  ;;  %v1180_v58 = vpop.f32.mrb[9].mxu0 }
 0x41a   : > { %v795_v59 = vpop.f32.mrb[10].mxu0 }
 0x41b   : > { %v1181_v60 = vpop.f32.mrb[11].mxu0  ;;  %v798_v61 = vsel %vm683_vm3, %v793_v57, -inf }
 0x41c   : > { %799 = vmax.xlane.f32.xlu0 %v798_v61 }
 0x436   : > { %v686_v62 = vpop.xlane.xlu1 %685 }
 0x437   : > { %v687_v63 = vsub.f32 %v678_v51, %v686_v62 }
 0x439   : > { %v688_v0 = vmul.f32 1.442695, %v687_v63 }
 0x43b   : > { %1307 = vpow2.f32 %v688_v0 }
 0x445   : > { %v1308_v2 = vpop.eup %1307 }
 0x446   : > { %v690_v3 = vsel %vm683_vm3, %v1308_v2, 0.0 }
 0x447   : > { %691 = vadd.xlane.f32.xlu0 %v690_v3 }
 0x45d   : > { %697 = vrot.lane.b32.xlu0 %v635_v37, %s1563_s21 }
 0x4a9   : > { %v800_v4 = vpop.xlane.xlu0 %799 }
 0x4aa   : > { %v801_v5 = vsub.f32 %v793_v57, %v800_v4 }
 0x4ac   : > { %v802_v6 = vmul.f32 1.442695, %v801_v5 }
 0x4ae   : > { %1309 = vpow2.f32 %v802_v6 }
 0x4b8   : > { %v1310_v7 = vpop.eup %1309 }
 0x4b9   : > { %v804_v8 = vsel %vm683_vm3, %v1310_v7, 0.0 }
 0x4ba   : > { %805 = vadd.xlane.f32.xlu1 %v804_v8 }
 0x4cb   : > { %810 = vrot.lane.b32.xlu1 %v635_v37, %s1564_s23 }
 0x4d4   : > { %v692_v9 = vpop.xlane.xlu0 %691 }
 0x4d5   : > { %1311 = vrcp.f32 %v692_v9 }
 0x4d8   : > { %v698_v10 = vpop.permute.xlu0 %697 }
 0x4d9   : > { %v704_v11 = vsel %vm702_vm4, %v698_v10, 0 }
 0x4da   : > { %1171 = vmatpush3.bf16.msra.mxu1 %v704_v11 }
 0x4db   : > { %1182 = vmatprep.subr.bf16.mxu1 %v1560_v16 }
 0x4df   : > { %v1312_v12 = vpop.eup %1311 }
 0x4e0   : > { %v694_v13 = vmul.f32 %v1312_v12, %v1308_v2 }
 0x4e2   : > { %v695_v14 = vpack.c.bf16 %v694_v13, %v694_v13 }
 0x4e4   : > { %1173 = vmatmul.mubr.msk.bf16.vlgmr.msra.gmra.mrb[4].mxu1 %vm683_vm3, %v695_v14 }
 0x4e5   : > { %1184 = vmatprep.mubr.msk.bf16.mxu1 %vm1561_vm1, %v1560_v16  ;;  %v1123_v16 = vld [vmem:[%s2011_s8] ss:$0 sm:$0xff] }
 0x547   : > { %v806_v15 = vpop.xlane.xlu1 %805 }
 0x548   : > { %1313 = vrcp.f32 %v806_v15 }
 0x54b   : > { %v811_v17 = vpop.permute.xlu1 %810 }
 0x54c   : > { %v816_v18 = vsel %vm702_vm4, %v811_v17, 0 }
 0x54d   : > { %1183 = vmatpush3.bf16.msra.mxu1 %v816_v18 }
 0x552   : > { %v1314_v19 = vpop.eup %1313 }
 0x553   : > { %v808_v20 = vmul.f32 %v1314_v19, %v1310_v7 }
 0x555   : > { %v809_v21 = vpack.c.bf16 %v808_v20, %v808_v20 }
 0x557   : > { %1185 = vmatmul.mubr.msk.bf16.vlgmr.msra.gmra.mrb[8].mxu1 %vm683_vm3, %v809_v21 }
 0x5b7   : > { %v740_v22 = vpop.f32.mrb[4].mxu1 }
 0x5b8   : > { %746 = vst.msk [vmem:[#allocation2] sm:$0xff] %vm636_vm2, %v740_v22  ;;  %v1174_v23 = vpop.f32.mrb[5].mxu1 }
 0x5b9   : > { %v743_v24 = vpop.f32.mrb[6].mxu1 }
 0x5ba   : > { %v1175_v25 = vpop.f32.mrb[7].mxu1 }
 0x62a   : > { %v852_v28 = vpop.f32.mrb[8].mxu1 }
 0x62b   : > { %859 = vrot.lane.b32.xlu1 %v852_v28, %s1565_s25  ;;  %v1186_v29 = vpop.f32.mrb[9].mxu1 }
 0x62c   : > { %v855_v30 = vpop.f32.mrb[10].mxu1 }
 0x62d   : > { %v1187_v31 = vpop.f32.mrb[11].mxu1 }
 0x69d   : > { %v860_v32 = vpop.permute.xlu1 %859 }
 0x69e   : > { %863 = vst.msk [vmem:[#allocation2] sm:$0xff] %vm862_vm5, %v860_v32 }
 0x6a5   : > { %v864_v33 = vld [vmem:[#allocation2] sm:$0xff] }
 0x6a6   : > { %v865_v34 = vpack.c.bf16 %v864_v33, %v864_v33 }
 0x6a8   : > { %1193 = vmatmul.mubr.msk.bf16.vlgmr.msra.gmra.mrb[12].mxu0 %vm472_vm0, %v865_v34 }
 0x77b   : > { %v926_v35 = vpop.f32.mrb[12].mxu0 }
 0x77c   : > { %v927_v36 = vadd.f32 %v1123_v16, %v926_v35  ;;  %v1194_v37 = vpop.f32.mrb[13].mxu0 }
 0x77d   : > { %v929_v38 = vpop.f32.mrb[14].mxu0 }
 0x77e   : > { %v932_v39 = vadd.f32 %v927_v36, %v1884_v1  ;;  %v1195_v40 = vpop.f32.mrb[15].mxu0 }
 0x780   : > { %933 = vst.msk [vmem:[%s467_s18] sm:$0xff] %vm472_vm0, %v932_v39 }
 0x781   : > { %1474 = shalt.err (!%p1471_p8)
}
 0x782   : > { %s1475_s3 = scalar_lea.hbm %s1953_s17, 128  ;;  %s1479_s26 = scalar_lea.hbm %s2068_s15, 256 }
 0x783   : > { %p1476_p0 = scmp.ne.s32.totalorder %s1953_s17, %s1475_s3  ;;  %p1480_p7 = scmp.lt.u32.totalorder %s1953_s17, %s2068_s15 }
 0x784   : > { %p1481_p13 = scmp.lt.u32.totalorder %s1479_s26, %s1475_s3  ;;  %p1483_p2 = scmp.lt.u32.totalorder %s1475_s3, %s1953_s17 }
 0x785   : > { %p1477_p5 = pnand %p1476_p0, %p2069_p4 }
 0x786   : > { %p1482_p9 = por %p1481_p13, %p1480_p7 }
 0x787   : > { %p1478_p12 = pneg %p1477_p5 }
 0x788   : > { %p1484_p1 = por %p1483_p2, %p1482_p9 }
 0x78a   : > { %p1485_p3 = pnand %p1484_p1, %p1478_p12 }
 0x78c   : > { %1488 = shalt.err (!%p1485_p3)
}
 0x78d   : > { %1210 = dma.vmem_to_hbm [thread:$0]  (%p2069_p4), %s1955_s19, 128, %s1953_s17, %s935_s12  }
 0x78e PF: > { %s2070_s23 = sld [smem:[#allocation17_spill]]  ;;  %s2071_s25 = sld [smem:[#allocation20_spill]] }
 0x78f   : > { %s2072_s27 = sld [smem:[#allocation19_spill]] }
 0x794   : > { %s961_s7 = sand.u32 1, %s2070_s23   ;;  %p2073_p11 = scmp.ne.s32.totalorder %s2071_s25, 0 }
 0x795   : > { %p2074_p10 = scmp.ge.s32.totalorder %s2072_s27, 2  ;;  %s962_s30 = scalar_lea.sflag [#allocation5], %s961_s7 }
 0x797   : > { %p1230_p6 = pnand %p2074_p10, %p2073_p11 }
 0x799   : > { %1526 = dma.done.wait (!%p1230_p6), %s962_s30, 128  }
 0x79a   : > { %1528 = vsyncadd (!%p1230_p6), %s962_s30, 4294967168  ;;  %s29_s14 = sadd.s32 1, %s2072_s27   ;;  %s2075_s29 = sld [smem:[#allocation22_spill]] }
 0x79b   : > { %p26_p8 = scmp.ge.s32.totalorder %s29_s14, 4   ;;  %s2076_s12 = sld [smem:[#allocation18_spill]] }
 0x79c   : > { %s2077_s13 = sld [smem:[#allocation21_spill]]  ;;  %s2078_s30 = smov %s1535_s10 }
 0x79d   : > { %s2079_s10 = smov %s1539_s11  ;;  %28 = sbr.rel (!%p26_p8) target bundleno = 14 (0xe), region = 133 }
 0x7a0   : > { %s2080_s11 = smov %s2075_s29 }
 0x7a4   :  { %967 = vsyncpa [#allocation4], 1 }
 0x7a5   :  { %969 = vsyncpa [#allocation4 + $0x1], 1 }
 0x7a6   :  { %970 = vsyncpa [#allocation7], 1 }
 0x7a7   :  { %972 = vsyncpa [#allocation7 + $0x1], 1 }
 0x7a8   :  { %973 = vsyncpa [#allocation10], 1 }
 0x7a9   :  { %974 = vsyncpa [#allocation5], 1 }
 0x7aa   :  { %976 = vsyncpa [#allocation5 + $0x1], 1 }

</bundles_post_ra>
